<compile_context>
chip_gen: v7x
topology: tpu7x:2x2x1
jax: 0.10.0
libtpu: 0.0.40
codegen_flags: <defaults>
</compile_context>

<pallas_src>
import functools

import jax
import jax.numpy as jnp
from jax import lax
from jax.experimental import pallas as pl
from jax.experimental.pallas import tpu as pltpu

_NEG_BIG = -1e30  # finite "minus infinity": keeps 0 * (masked value) finite


def _round_up(x, m):
    return ((x + m - 1) // m) * m


def _vmem_capacity_bytes():
    try:
        return int(pltpu.get_tpu_info().vmem_capacity_bytes)
    except Exception:  # conservative fallback sized for v7x
        return 64 * 1024 * 1024


def _partials_kernel(feat_ref, logits_ref, labels_ref,
                     sums_ref, counts_ref, ce_ref, fsq_ref,
                     *, num_classes):
    """Accumulates per-core partials over one N tile."""

    @pl.when(pl.program_id(1) == 0)
    def _init():
        sums_ref[...] = jnp.zeros_like(sums_ref)
        counts_ref[...] = jnp.zeros_like(counts_ref)
        ce_ref[...] = jnp.zeros_like(ce_ref)
        fsq_ref[...] = jnp.zeros_like(fsq_ref)

    feats = feat_ref[...].astype(jnp.float32)     # (TN, Dp)  zero-padded rows / lanes
    logits = logits_ref[...].astype(jnp.float32)  # (TN, Cp)  padded class cols = -1e30
    labels = labels_ref[...].astype(jnp.float32)  # (TN, Cp)  zero-padded

    tn, cp = logits.shape

    # ---- cross-entropy partial (probability targets), logp never materialized ----
    m = jnp.max(logits, axis=1, keepdims=True)
    z = logits - m
    lse = jnp.log(jnp.sum(jnp.exp(z), axis=1, keepdims=True))
    lab_sum = jnp.sum(labels, axis=1, keepdims=True)
    ce_part = jnp.sum(lab_sum * lse) - jnp.sum(labels * z)

    # ---- argmax (first max on ties) -> one-hot ------------------------------
    col = lax.broadcasted_iota(jnp.int32, (tn, cp), 1)
    if cp != num_classes:
        # Loop-invariant additive column bias keeps padded class lanes out of argmax.
        cbias = jnp.where(
            lax.broadcasted_iota(jnp.int32, (1, cp), 1) < num_classes,
            0.0, _NEG_BIG).astype(jnp.float32)
        labels_a = labels + cbias
    else:
        labels_a = labels
    lmax = jnp.max(labels_a, axis=1, keepdims=True)
    idx = jnp.min(jnp.where(labels_a == lmax, col, cp), axis=1, keepdims=True)
    # Padded (all-zero-label) rows land on class 0; corrected in the wrapper.
    onehot = (col == idx).astype(jnp.float32)

    # ---- per-class feature sums / counts / sum||f||^2 -----------------------
    sums_ref[...] += lax.dot_general(onehot, feats, (((0,), (0,)), ((), ())),
                                     preferred_element_type=jnp.float32)   # (Cp, Dp)
    counts_ref[...] += jnp.sum(onehot, axis=0, keepdims=True)              # (1, Cp)
    ce_ref[...] += jnp.reshape(ce_part, (1, 1))
    fsq_ref[...] += jnp.reshape(jnp.sum(feats * feats), (1, 1))


def combined_loss(features, outputs, labels, *, num_classes,
                  alpha=1.0, beta=1.0, max_tile_n=1024):
    n, d = features.shape
    assert outputs.shape == (n, num_classes)
    assert labels.shape == (n, num_classes)

    c_pad = _round_up(num_classes, 128)   # lane-dense class axis
    d_pad = _round_up(d, 128)             # lane-dense feature axis

    vmem_cap = _vmem_capacity_bytes()
    vmem_budget = min(vmem_cap // 3, 48 << 20)   # ~21 MiB on v7x, ~42 MiB on v5e/v6e

    def _footprint(t):
        in_blk = t * d_pad * 4 + 2 * t * c_pad * 4          # feats + logits + labels
        out_blk = (c_pad * d_pad + c_pad + 2) * 4            # resident per-core partials
        return 2 * (in_blk + out_blk)                        # x2: double buffering

    tile_n = max(8, min(_round_up(max_tile_n, 8), _round_up(n, 8)))
    while tile_n > 8 and _footprint(tile_n) > vmem_budget:
        tile_n = max(8, _round_up(tile_n // 2, 8))

    steps_total = -(-n // tile_n)
    ncore = 2 if steps_total >= 2 else 1          # feeds both TensorCores on v7x
    steps = -(-steps_total // ncore)
    n_pad = ncore * steps * tile_n

    # ---- wrapper-side padding (bakes the masks out of the hot loop) ---------
    feats_p = features
    if n_pad != n or d_pad != d:
        feats_p = jnp.pad(features, ((0, n_pad - n), (0, d_pad - d)))
    logits_p = outputs
    if c_pad != num_classes:
        logits_p = jnp.pad(logits_p, ((0, 0), (0, c_pad - num_classes)),
                           constant_values=_NEG_BIG)
    if n_pad != n:
        logits_p = jnp.pad(logits_p, ((0, n_pad - n), (0, 0)))
    labels_p = labels
    if n_pad != n or c_pad != num_classes:
        labels_p = jnp.pad(labels, ((0, n_pad - n), (0, c_pad - num_classes)))

    kernel = functools.partial(_partials_kernel, num_classes=num_classes)
    vmem_limit = int(min(vmem_cap // 2,
                         max(32 << 20, _footprint(tile_n) + (4 << 20))))

    sums_o, counts_o, ce_o, fsq_o = pl.pallas_call(
        kernel,
        grid=(ncore, steps),
        out_shape=(
            jax.ShapeDtypeStruct((ncore, c_pad, d_pad), jnp.float32),
            jax.ShapeDtypeStruct((ncore, 1, c_pad), jnp.float32),
            jax.ShapeDtypeStruct((ncore, 1, 1), jnp.float32),
            jax.ShapeDtypeStruct((ncore, 1, 1), jnp.float32),
        ),
        in_specs=[
            pl.BlockSpec((tile_n, d_pad), lambda c, s: (c * steps + s, 0)),
            pl.BlockSpec((tile_n, c_pad), lambda c, s: (c * steps + s, 0)),
            pl.BlockSpec((tile_n, c_pad), lambda c, s: (c * steps + s, 0)),
        ],
        out_specs=(
            pl.BlockSpec((None, c_pad, d_pad), lambda c, s: (c, 0, 0)),
            pl.BlockSpec((None, 1, c_pad), lambda c, s: (c, 0, 0)),
            pl.BlockSpec((None, 1, 1), lambda c, s: (c, 0, 0)),
            pl.BlockSpec((None, 1, 1), lambda c, s: (c, 0, 0)),
        ),
        compiler_params=pltpu.CompilerParams(
            dimension_semantics=("parallel", "arbitrary"),
            vmem_limit_bytes=vmem_limit),
    )(feats_p, logits_p, labels_p)

    # ---- tiny O(C*D) epilogue: combine per-core partials, build centers -----
    sums = jnp.sum(sums_o, axis=0)                    # (Cp, Dp)
    counts = jnp.sum(counts_o, axis=0)[0]             # (Cp,)
    ce_sum = jnp.sum(ce_o)
    fsq = jnp.sum(fsq_o)
    if n_pad != n:
        # Padded (all-zero-label) rows argmax to class 0 in the kernel; remove them.
        counts = counts.at[0].add(jnp.float32(n - n_pad))
    counts_col = counts[:, None]                       # (Cp, 1)

    centers = jnp.where(counts_col > 0.0,
                        sums / jnp.maximum(counts_col, 1.0), 0.0) + 1e-6
    cmask = (jnp.arange(c_pad) < num_classes).astype(jnp.float32)[:, None]
    dmask = (jnp.arange(d_pad) < d).astype(jnp.float32)[None, :]
    centers = centers * cmask * dmask                  # drop padded classes / lanes

    # intra = sum||f||^2 - 2*sum_c<sums_c,centers_c> + sum_c counts_c*||centers_c||^2
    intra = fsq - 2.0 * jnp.sum(sums * centers) + jnp.sum(counts_col * centers * centers)

    center_mean = jnp.sum(centers, axis=0, keepdims=True) / num_classes
    diff = (centers - center_mean) * cmask
    inter = jnp.sum(diff * diff) / num_classes

    ce = ce_sum / n
    return alpha * ce + beta * intra / (inter + 1e-6)


def _reference(features, outputs, labels, num_classes, alpha=1.0, beta=1.0):
    # Pure-JAX reference mirroring the PyTorch module.
    n = features.shape[0]
    logp = jax.nn.log_softmax(outputs, axis=1)
    ce = -jnp.sum(labels * logp) / n
    idx = jnp.argmax(labels, axis=1)
    onehot = jax.nn.one_hot(idx, num_classes, dtype=jnp.float32)
    counts = onehot.sum(axis=0)[:, None]
    sums = jnp.einsum('nc,nd->cd', onehot, features,
                      precision=jax.lax.Precision.HIGHEST)
    centers = jnp.where(counts > 0, sums / jnp.maximum(counts, 1.0), 0.0) + 1e-6
    centers_batch = centers[idx]
    intra = jnp.sum((features - centers_batch) ** 2)
    inter = jnp.sum((centers - centers.mean(axis=0, keepdims=True)) ** 2) / num_classes
    return alpha * ce + beta * intra / (inter + 1e-6)


if __name__ == "__main__":
    def _check(n, d, c, max_tile_n, key):
        kf, ko, kl = jax.random.split(key, 3)
        features = jax.random.normal(kf, (n, d), dtype=jnp.float32)
        outputs = jax.random.normal(ko, (n, c), dtype=jnp.float32)
        class_ids = jax.random.randint(kl, (n,), 0, c)
        labels = jax.nn.one_hot(class_ids, c, dtype=jnp.float32)
        loss = combined_loss(features, outputs, labels, num_classes=c,
                             alpha=1.0, beta=1.0, max_tile_n=max_tile_n)
        loss = jax.block_until_ready(loss)
        ref = _reference(features, outputs, labels, c, 1.0, 1.0)
        assert jnp.allclose(loss, ref, rtol=1e-3, atol=1e-3), (n, d, c, loss, ref)

    key = jax.random.PRNGKey(0)
    k1, k2 = jax.random.split(key)
    _check(8, 32, 4, 1024, k1)    # single tile, single core slot
    _check(100, 40, 6, 32, k2)    # multi-tile, 2-way core split, row/class/lane padding
    print("KERNEL_OK")
</pallas_src>

<mosaic_0001>
module attributes {stable_mosaic.version = 11 : i64} {
  func.func @_partials_kernel(%arg0: i32, %arg1: i32, %arg2: memref<8x128xf32, #tpu.memory_space<vmem>>, %arg3: memref<8x128xf32, #tpu.memory_space<vmem>>, %arg4: memref<8x128xf32, #tpu.memory_space<vmem>>, %arg5: memref<1x128x128xf32, #tpu.memory_space<vmem>>, %arg6: memref<1x1x128xf32, #tpu.memory_space<vmem>>, %arg7: memref<1x1x1xf32, #tpu.memory_space<vmem>>, %arg8: memref<1x1x1xf32, #tpu.memory_space<vmem>>) attributes {dimension_semantics = [#tpu.dimension_semantics<parallel>, #tpu.dimension_semantics<arbitrary>], iteration_bounds = array<i64: 1, 1>, scalar_prefetch = 0 : i64, scratch_operands = 0 : i64, tpu.core_type = #tpu.core_type<tc>, window_params = [{transform_indices = @transform_0, window_bounds = array<i64: 8, 128>}, {transform_indices = @transform_1, window_bounds = array<i64: 8, 128>}, {transform_indices = @transform_2, window_bounds = array<i64: 8, 128>}, {transform_indices = @transform_3, window_bounds = array<i64: 1, 128, 128>}, {transform_indices = @transform_4, window_bounds = array<i64: 1, 1, 128>}, {transform_indices = @transform_5, window_bounds = array<i64: 1, 1, 1>}, {transform_indices = @transform_6, window_bounds = array<i64: 1, 1, 1>}]} {
    %c0_i32 = arith.constant 0 : i32
    %0 = arith.cmpi eq, %arg1, %c0_i32 : i32
    %1 = arith.extui %0 : i1 to i32
    %c0_i32_0 = arith.constant 0 : i32
    %2 = arith.cmpi ne, %1, %c0_i32_0 : i32
    scf.if %2 {
      %cst_41 = arith.constant 0.000000e+00 : f32
      %82 = vector.broadcast %cst_41 : f32 to vector<128x128xf32>
      %c0_42 = arith.constant 0 : index
      %c0_43 = arith.constant 0 : index
      %c0_44 = arith.constant 0 : index
      %83 = vector.load %arg5[%c0_42, %c0_43, %c0_44] : memref<1x128x128xf32, #tpu.memory_space<vmem>>, vector<1x128x128xf32>
      %84 = vector.shape_cast %83 : vector<1x128x128xf32> to vector<128x128xf32>
      %85 = vector.shape_cast %82 : vector<128x128xf32> to vector<1x128x128xf32>
      tpu.vector_store %arg5[%c0_42, %c0_43, %c0_44], %85 {strides = array<i32>} : memref<1x128x128xf32, #tpu.memory_space<vmem>>, vector<1x128x128xf32>,
      %cst_45 = arith.constant 0.000000e+00 : f32
      %86 = vector.broadcast %cst_45 : f32 to vector<1x128xf32>
      %c0_46 = arith.constant 0 : index
      %c0_47 = arith.constant 0 : index
      %c0_48 = arith.constant 0 : index
      %87 = vector.load %arg6[%c0_46, %c0_47, %c0_48] : memref<1x1x128xf32, #tpu.memory_space<vmem>>, vector<1x1x128xf32>
      %88 = vector.shape_cast %87 : vector<1x1x128xf32> to vector<1x128xf32>
      %89 = vector.shape_cast %86 : vector<1x128xf32> to vector<1x1x128xf32>
      tpu.vector_store %arg6[%c0_46, %c0_47, %c0_48], %89 {strides = array<i32>} : memref<1x1x128xf32, #tpu.memory_space<vmem>>, vector<1x1x128xf32>,
      %cst_49 = arith.constant 0.000000e+00 : f32
      %90 = vector.broadcast %cst_49 : f32 to vector<1x1xf32>
      %c0_50 = arith.constant 0 : index
      %c0_51 = arith.constant 0 : index
      %c0_52 = arith.constant 0 : index
      %91 = vector.load %arg7[%c0_50, %c0_51, %c0_52] : memref<1x1x1xf32, #tpu.memory_space<vmem>>, vector<1x1x1xf32>
      %92 = vector.shape_cast %91 : vector<1x1x1xf32> to vector<1x1xf32>
      %93 = vector.shape_cast %90 : vector<1x1xf32> to vector<1x1x1xf32>
      tpu.vector_store %arg7[%c0_50, %c0_51, %c0_52], %93 {strides = array<i32>} : memref<1x1x1xf32, #tpu.memory_space<vmem>>, vector<1x1x1xf32>,
      %cst_53 = arith.constant 0.000000e+00 : f32
      %94 = vector.broadcast %cst_53 : f32 to vector<1x1xf32>
      %c0_54 = arith.constant 0 : index
      %c0_55 = arith.constant 0 : index
      %c0_56 = arith.constant 0 : index
      %95 = vector.load %arg8[%c0_54, %c0_55, %c0_56] : memref<1x1x1xf32, #tpu.memory_space<vmem>>, vector<1x1x1xf32>
      %96 = vector.shape_cast %95 : vector<1x1x1xf32> to vector<1x1xf32>
      %97 = vector.shape_cast %94 : vector<1x1xf32> to vector<1x1x1xf32>
      tpu.vector_store %arg8[%c0_54, %c0_55, %c0_56], %97 {strides = array<i32>} : memref<1x1x1xf32, #tpu.memory_space<vmem>>, vector<1x1x1xf32>,
    } else {
    }
    %c0 = arith.constant 0 : index
    %c0_1 = arith.constant 0 : index
    %3 = vector.load %arg2[%c0, %c0_1] : memref<8x128xf32, #tpu.memory_space<vmem>>, vector<8x128xf32>
    %c0_2 = arith.constant 0 : index
    %c0_3 = arith.constant 0 : index
    %4 = vector.load %arg3[%c0_2, %c0_3] : memref<8x128xf32, #tpu.memory_space<vmem>>, vector<8x128xf32>
    %c0_4 = arith.constant 0 : index
    %c0_5 = arith.constant 0 : index
    %5 = vector.load %arg4[%c0_4, %c0_5] : memref<8x128xf32, #tpu.memory_space<vmem>>, vector<8x128xf32>
    %cst = arith.constant dense<0xFF800000> : vector<8xf32>
    %6 = vector.multi_reduction <maximumf>, %4, %cst [1] : vector<8x128xf32> to vector<8xf32>
    %7 = vector.shape_cast %6 : vector<8xf32> to vector<8x1xf32>
    %8 = vector.broadcast %7 : vector<8x1xf32> to vector<8x128xf32>
    %9 = arith.subf %4, %8 : vector<8x128xf32>
    %10 = math.exp %9 : vector<8x128xf32>
    %cst_6 = arith.constant dense<0.000000e+00> : vector<8xf32>
    %11 = vector.multi_reduction <add>, %10, %cst_6 [1] : vector<8x128xf32> to vector<8xf32>
    %12 = vector.shape_cast %11 : vector<8xf32> to vector<8x1xf32>
    %13 = math.log %12 : vector<8x1xf32>
    %cst_7 = arith.constant dense<0.000000e+00> : vector<8xf32>
    %14 = vector.multi_reduction <add>, %5, %cst_7 [1] : vector<8x128xf32> to vector<8xf32>
    %15 = vector.shape_cast %14 : vector<8xf32> to vector<8x1xf32>
    %16 = arith.mulf %15, %13 : vector<8x1xf32>
    %17 = vector.shape_cast %16 : vector<8x1xf32> to vector<1x8x1xf32>
    %cst_8 = arith.constant dense<0.000000e+00> : vector<1xf32>
    %18 = vector.multi_reduction <add>, %17, %cst_8 [1, 2] : vector<1x8x1xf32> to vector<1xf32>
    %19 = vector.shape_cast %18 : vector<1xf32> to vector<1x1x1xf32>
    %20 = vector.extract %19[0, 0, 0] : f32 from vector<1x1x1xf32>
    %21 = arith.mulf %5, %9 : vector<8x128xf32>
    %22 = vector.shape_cast %21 : vector<8x128xf32> to vector<1x8x128xf32>
    %cst_9 = arith.constant dense<0.000000e+00> : vector<1xf32>
    %23 = vector.multi_reduction <add>, %22, %cst_9 [1, 2] : vector<1x8x128xf32> to vector<1xf32>
    %24 = vector.shape_cast %23 : vector<1xf32> to vector<1x1x1xf32>
    %25 = vector.extract %24[0, 0, 0] : f32 from vector<1x1x1xf32>
    %26 = arith.subf %20, %25 : f32
    %27 = tpu.iota {dimensions = array<i32: 1>} : vector<8x128xi32>
    %28 = tpu.iota {dimensions = array<i32: 1>} : vector<1x128xi32>
    %c4_i32 = arith.constant 4 : i32
    %29 = vector.broadcast %c4_i32 : i32 to vector<1x128xi32>
    %30 = arith.cmpi slt, %28, %29 : vector<1x128xi32>
    %cst_10 = arith.constant 0.000000e+00 : f32
    %cst_11 = arith.constant -1.000000e+30 : f32
    %31 = vector.broadcast %cst_10 : f32 to vector<1x128xf32>
    %32 = vector.broadcast %cst_11 : f32 to vector<1x128xf32>
    %33 = arith.select %30, %31, %32 : vector<1x128xi1>, vector<1x128xf32>
    %34 = vector.broadcast %33 : vector<1x128xf32> to vector<8x128xf32>
    %35 = arith.addf %5, %34 : vector<8x128xf32>
    %cst_12 = arith.constant dense<0xFF800000> : vector<8xf32>
    %36 = vector.multi_reduction <maximumf>, %35, %cst_12 [1] : vector<8x128xf32> to vector<8xf32>
    %37 = vector.shape_cast %36 : vector<8xf32> to vector<8x1xf32>
    %38 = vector.broadcast %37 : vector<8x1xf32> to vector<8x128xf32>
    %39 = arith.cmpf oeq, %35, %38 : vector<8x128xf32>
    %c128_i32 = arith.constant 128 : i32
    %40 = vector.broadcast %c128_i32 : i32 to vector<8x128xi32>
    %41 = arith.select %39, %27, %40 : vector<8x128xi1>, vector<8x128xi32>
    %cst_13 = arith.constant dense<2147483647> : vector<8xi32>
    %42 = vector.multi_reduction <minsi>, %41, %cst_13 [1] : vector<8x128xi32> to vector<8xi32>
    %43 = vector.shape_cast %42 : vector<8xi32> to vector<8x1xi32>
    %44 = vector.broadcast %43 : vector<8x1xi32> to vector<8x128xi32>
    %45 = arith.cmpi eq, %27, %44 : vector<8x128xi32>
    %46 = arith.extui %45 : vector<8x128xi1> to vector<8x128xi32>
    %47 = arith.sitofp %46 : vector<8x128xi32> to vector<8x128xf32>
    %c0_14 = arith.constant 0 : index
    %c0_15 = arith.constant 0 : index
    %c0_16 = arith.constant 0 : index
    %48 = vector.load %arg5[%c0_14, %c0_15, %c0_16] : memref<1x128x128xf32, #tpu.memory_space<vmem>>, vector<1x128x128xf32>
    %49 = vector.shape_cast %48 : vector<1x128x128xf32> to vector<128x128xf32>
    %cst_17 = arith.constant dense<0.000000e+00> : vector<128x128xf32>
    %50 = tpu.matmul %47, %3, %cst_17 {dimension_numbers = #tpu.dot_dimension_numbers<[0], [0], [1], [1], [0, 1, 1, 1], [], []>} : vector<8x128xf32>, vector<8x128xf32>, vector<128x128xf32> -> vector<128x128xf32>
    %51 = arith.addf %49, %50 : vector<128x128xf32>
    %c0_18 = arith.constant 0 : index
    %c0_19 = arith.constant 0 : index
    %c0_20 = arith.constant 0 : index
    %52 = vector.load %arg5[%c0_18, %c0_19, %c0_20] : memref<1x128x128xf32, #tpu.memory_space<vmem>>, vector<1x128x128xf32>
    %53 = vector.shape_cast %52 : vector<1x128x128xf32> to vector<128x128xf32>
    %54 = vector.shape_cast %51 : vector<128x128xf32> to vector<1x128x128xf32>
    tpu.vector_store %arg5[%c0_18, %c0_19, %c0_20], %54 {strides = array<i32>} : memref<1x128x128xf32, #tpu.memory_space<vmem>>, vector<1x128x128xf32>,
    %c0_21 = arith.constant 0 : index
    %c0_22 = arith.constant 0 : index
    %c0_23 = arith.constant 0 : index
    %55 = vector.load %arg6[%c0_21, %c0_22, %c0_23] : memref<1x1x128xf32, #tpu.memory_space<vmem>>, vector<1x1x128xf32>
    %56 = vector.shape_cast %55 : vector<1x1x128xf32> to vector<1x128xf32>
    %cst_24 = arith.constant dense<0.000000e+00> : vector<128xf32>
    %57 = vector.multi_reduction <add>, %47, %cst_24 [0] : vector<8x128xf32> to vector<128xf32>
    %58 = vector.shape_cast %57 : vector<128xf32> to vector<1x128xf32>
    %59 = arith.addf %56, %58 : vector<1x128xf32>
    %c0_25 = arith.constant 0 : index
    %c0_26 = arith.constant 0 : index
    %c0_27 = arith.constant 0 : index
    %60 = vector.load %arg6[%c0_25, %c0_26, %c0_27] : memref<1x1x128xf32, #tpu.memory_space<vmem>>, vector<1x1x128xf32>
    %61 = vector.shape_cast %60 : vector<1x1x128xf32> to vector<1x128xf32>
    %62 = vector.shape_cast %59 : vector<1x128xf32> to vector<1x1x128xf32>
    tpu.vector_store %arg6[%c0_25, %c0_26, %c0_27], %62 {strides = array<i32>} : memref<1x1x128xf32, #tpu.memory_space<vmem>>, vector<1x1x128xf32>,
    %c0_28 = arith.constant 0 : index
    %c0_29 = arith.constant 0 : index
    %c0_30 = arith.constant 0 : index
    %63 = vector.load %arg7[%c0_28, %c0_29, %c0_30] : memref<1x1x1xf32, #tpu.memory_space<vmem>>, vector<1x1x1xf32>
    %64 = vector.shape_cast %63 : vector<1x1x1xf32> to vector<1x1xf32>
    %65 = vector.broadcast %26 : f32 to vector<1x1xf32>
    %66 = arith.addf %64, %65 : vector<1x1xf32>
    %c0_31 = arith.constant 0 : index
    %c0_32 = arith.constant 0 : index
    %c0_33 = arith.constant 0 : index
    %67 = vector.load %arg7[%c0_31, %c0_32, %c0_33] : memref<1x1x1xf32, #tpu.memory_space<vmem>>, vector<1x1x1xf32>
    %68 = vector.shape_cast %67 : vector<1x1x1xf32> to vector<1x1xf32>
    %69 = vector.shape_cast %66 : vector<1x1xf32> to vector<1x1x1xf32>
    tpu.vector_store %arg7[%c0_31, %c0_32, %c0_33], %69 {strides = array<i32>} : memref<1x1x1xf32, #tpu.memory_space<vmem>>, vector<1x1x1xf32>,
    %c0_34 = arith.constant 0 : index
    %c0_35 = arith.constant 0 : index
    %c0_36 = arith.constant 0 : index
    %70 = vector.load %arg8[%c0_34, %c0_35, %c0_36] : memref<1x1x1xf32, #tpu.memory_space<vmem>>, vector<1x1x1xf32>
    %71 = vector.shape_cast %70 : vector<1x1x1xf32> to vector<1x1xf32>
    %72 = arith.mulf %3, %3 : vector<8x128xf32>
    %73 = vector.shape_cast %72 : vector<8x128xf32> to vector<1x8x128xf32>
    %cst_37 = arith.constant dense<0.000000e+00> : vector<1xf32>
    %74 = vector.multi_reduction <add>, %73, %cst_37 [1, 2] : vector<1x8x128xf32> to vector<1xf32>
    %75 = vector.shape_cast %74 : vector<1xf32> to vector<1x1x1xf32>
    %76 = vector.extract %75[0, 0, 0] : f32 from vector<1x1x1xf32>
    %77 = vector.broadcast %76 : f32 to vector<1x1xf32>
    %78 = arith.addf %71, %77 : vector<1x1xf32>
    %c0_38 = arith.constant 0 : index
    %c0_39 = arith.constant 0 : index
    %c0_40 = arith.constant 0 : index
    %79 = vector.load %arg8[%c0_38, %c0_39, %c0_40] : memref<1x1x1xf32, #tpu.memory_space<vmem>>, vector<1x1x1xf32>
    %80 = vector.shape_cast %79 : vector<1x1x1xf32> to vector<1x1xf32>
    %81 = vector.shape_cast %78 : vector<1x1xf32> to vector<1x1x1xf32>
    tpu.vector_store %arg8[%c0_38, %c0_39, %c0_40], %81 {strides = array<i32>} : memref<1x1x1xf32, #tpu.memory_space<vmem>>, vector<1x1x1xf32>,
    return
  }
  func.func @transform_0(%arg0: i32, %arg1: i32) -> (i32, i32) {
    %c1_i32 = arith.constant 1 : i32
    %0 = arith.muli %arg0, %c1_i32 : i32
    %1 = arith.addi %0, %arg1 : i32
    %c0_i32 = arith.constant 0 : i32
    %c0_i32_0 = arith.constant 0 : i32
    return %1, %c0_i32 : i32, i32
  }
  func.func @transform_1(%arg0: i32, %arg1: i32) -> (i32, i32) {
    %c1_i32 = arith.constant 1 : i32
    %0 = arith.muli %arg0, %c1_i32 : i32
    %1 = arith.addi %0, %arg1 : i32
    %c0_i32 = arith.constant 0 : i32
    %c0_i32_0 = arith.constant 0 : i32
    return %1, %c0_i32 : i32, i32
  }
  func.func @transform_2(%arg0: i32, %arg1: i32) -> (i32, i32) {
    %c1_i32 = arith.constant 1 : i32
    %0 = arith.muli %arg0, %c1_i32 : i32
    %1 = arith.addi %0, %arg1 : i32
    %c0_i32 = arith.constant 0 : i32
    %c0_i32_0 = arith.constant 0 : i32
    return %1, %c0_i32 : i32, i32
  }
  func.func @transform_3(%arg0: i32, %arg1: i32) -> (i32, i32, i32) {
    %c0_i32 = arith.constant 0 : i32
    %c0_i32_0 = arith.constant 0 : i32
    %c0_i32_1 = arith.constant 0 : i32
    return %arg0, %c0_i32, %c0_i32_0 : i32, i32, i32
  }
  func.func @transform_4(%arg0: i32, %arg1: i32) -> (i32, i32, i32) {
    %c0_i32 = arith.constant 0 : i32
    %c0_i32_0 = arith.constant 0 : i32
    %c0_i32_1 = arith.constant 0 : i32
    return %arg0, %c0_i32, %c0_i32_0 : i32, i32, i32
  }
  func.func @transform_5(%arg0: i32, %arg1: i32) -> (i32, i32, i32) {
    %c0_i32 = arith.constant 0 : i32
    %c0_i32_0 = arith.constant 0 : i32
    %c0_i32_1 = arith.constant 0 : i32
    return %arg0, %c0_i32, %c0_i32_0 : i32, i32, i32
  }
  func.func @transform_6(%arg0: i32, %arg1: i32) -> (i32, i32, i32) {
    %c0_i32 = arith.constant 0 : i32
    %c0_i32_0 = arith.constant 0 : i32
    %c0_i32_1 = arith.constant 0 : i32
    return %arg0, %c0_i32, %c0_i32_0 : i32, i32, i32
  }
}

</mosaic_0001>

<bundles_post_ra>
// kernel: tpu_custom_call.1
= control target key start
LH: loop header
LB: loop body
LE: loop exit
PB: predicated region body
PF: predicated region fallthrough
CT: control target
= control target key end

     0   :  { %12 = vsyncpa [#allocation3], 0  ;;  %s930_s0 = inlined_call_operand.hbm [shape: f32[8,128], index: 0, kind: input, shape index: {}]   ;;  %s931_s1 = inlined_call_operand.hbm [shape: f32[8,128], index: 1, kind: input, shape index: {}]   ;;  %s932_s2 = inlined_call_operand.hbm [shape: f32[8,128], index: 2, kind: input, shape index: {}]   ;;  %s933_s3 = inlined_call_operand.hbm [shape: f32[1,128,128], index: 3, kind: output, shape index: {0}]   ;;  %s934_s4 = inlined_call_operand.hbm [shape: f32[1,1,128], index: 4, kind: output, shape index: {1}]   ;;  %s935_s5 = inlined_call_operand.hbm [shape: f32[1,1,1], index: 5, kind: output, shape index: {2}]   ;;  %s936_s6 = inlined_call_operand.hbm [shape: f32[1,1,1], index: 6, kind: output, shape index: {3}]  }
   0x1   :  { %13 = vsyncpa [#allocation6], 0 }
   0x2   :  { %14 = vsyncpa [#allocation4], 0 }
   0x3   :  { %15 = vsyncpa [#allocation10], 0 }
   0x4   :  { %16 = vsyncpa [#allocation13], 0  ;;  %s763_s21 = smov [#allocation5]   ;;  %s764_s23 = smov [#allocation2]  }
   0x5   :  { %s39_s22 = sshll.u32 %s763_s21, 4  ;;  %s26_s24 = sshll.u32 %s764_s23, 4  ;;  %s40_s22 = int_to_ptr.vmem [resolvable:$true] %s39_s22  ;;  %s27_s24 = int_to_ptr.vmem [resolvable:$true] %s26_s24 }
   0x6   :  { %s599_s27 = scalar_lea.hbm %s931_s1, 128 }
   0x7   :  { %p600_p0 = scmp.ne.s32.totalorder %s931_s1, %s599_s27  ;;  %p603_p1 = scmp.lt.u32.totalorder %s599_s27, %s931_s1 }
   0x9   :  { %p605_p2 = pnand %p603_p1, %p600_p0 }
   0xb   :  { %608 = shalt.err (!%p605_p2)
}
   0xc   :  { %s609_s8 = scalar_lea.vmem %s40_s22, 128  ;;  %p614_p4 = scmp.lt.s32.totalorder %s40_s22, %s40_s22 }
   0xd   :  { %p610_p3 = scmp.ne.s32.totalorder %s40_s22, %s609_s8  ;;  %p615_p5 = scmp.lt.s32.totalorder %s609_s8, %s609_s8 }
   0xf   :  { %p616_p6 = por %p615_p5, %p614_p4 }
  0x11   :  { %p617_p7 = pnand %p616_p6, %p610_p3 }
  0x13   :  { %620 = shalt.err (!%p617_p7)
}
  0x14   :  { %42 = dma.hbm_to_vmem [thread:$0]  %s931_s1, 128, %s40_s22, [#allocation6]  }
  0x15   :  { %s621_s13 = scalar_lea.hbm %s930_s0, 128 }
  0x16   :  { %p622_p8 = scmp.ne.s32.totalorder %s930_s0, %s621_s13  ;;  %p625_p9 = scmp.lt.u32.totalorder %s621_s13, %s930_s0 }
  0x18   :  { %p627_p10 = pnand %p625_p9, %p622_p8 }
  0x1a   :  { %630 = shalt.err (!%p627_p10)
}
  0x1b   :  { %s631_s18 = scalar_lea.vmem %s27_s24, 128  ;;  %p636_p12 = scmp.lt.s32.totalorder %s27_s24, %s27_s24 }
  0x1c   :  { %p632_p11 = scmp.ne.s32.totalorder %s27_s24, %s631_s18  ;;  %p637_p13 = scmp.lt.s32.totalorder %s631_s18, %s631_s18 }
  0x1e   :  { %p638_p0 = por %p637_p13, %p636_p12 }
  0x20   :  { %p639_p1 = pnand %p638_p0, %p632_p11 }
  0x22   :  { %642 = shalt.err (!%p639_p1)
}
  0x23   :  { %29 = dma.hbm_to_vmem [thread:$0]  %s930_s0, 128, %s27_s24, [#allocation3]  }
  0x24   :  { %s765_s20 = smov [#allocation7]   ;;  %s643_s25 = scalar_lea.hbm %s932_s2, 128 }
  0x25   :  { %s52_s21 = sshll.u32 %s765_s20, 4  ;;  %p644_p2 = scmp.ne.s32.totalorder %s932_s2, %s643_s25  ;;  %s53_s21 = int_to_ptr.vmem [resolvable:$true] %s52_s21 }
  0x26   :  { %p647_p3 = scmp.lt.u32.totalorder %s643_s25, %s932_s2 }
  0x28   :  { %p649_p4 = pnand %p647_p3, %p644_p2 }
  0x2a   :  { %652 = shalt.err (!%p649_p4)
}
  0x2b   :  { %s653_s30 = scalar_lea.vmem %s53_s21, 128  ;;  %p658_p6 = scmp.lt.s32.totalorder %s53_s21, %s53_s21 }
  0x2c   :  { %p654_p5 = scmp.ne.s32.totalorder %s53_s21, %s653_s30  ;;  %p659_p7 = scmp.lt.s32.totalorder %s653_s30, %s653_s30 }
  0x2e   :  { %p660_p8 = por %p659_p7, %p658_p6 }
  0x30   :  { %p661_p9 = pnand %p660_p8, %p654_p5 }
  0x32   :  { %664 = shalt.err (!%p661_p9)
}
  0x33   :  { %55 = dma.hbm_to_vmem [thread:$0]  %s932_s2, 128, %s53_s21, [#allocation6]  }
  0x34   :  { %753 = dma.done.wait [#allocation3], 128  }
  0x35   :  { %754 = vsyncadd [#allocation3], 4294967168 }
  0x36   :  { %755 = dma.done.wait [#allocation6], 256  }
  0x37   :  { %756 = vsyncadd [#allocation6], 4294967040  ;;  %v129_v0 = vlaneseq  ;;  %v766_v2 = vmov -1e+30   ;;  %v845_v4 = vld [vmem:[#allocation7] sm:$0xff]  ;;  %v93_v14 = vld [vmem:[#allocation5] sm:$0xff] }
  0x38   :  { %v767_v15 = vmov 0.0   ;;  %v92_v26 = vld [vmem:[#allocation2] sm:$0xff]  ;;  %vm203_vm4 = vcmask 64512   ;;  %vm107_vm5 = vcmask 7168   ;;  %vm89_vm6 = vcmask 0   ;;  %s768_s2 = smov [#allocation9]  }
  0x39   :  { %v130_v1 = vand.u32 127, %v129_v0  ;;  %88 = vst [vmem:[#allocation9] sm:$0x1] %v767_v15  ;;  %550 = vmatprep.subr.mxu0 %v92_v26  ;;  %576 = vmatprep.subr.mxu1 %v92_v26  ;;  %v444_v54 = vmul.f32 %v92_v26, %v92_v26  ;;  %90 = vst.msk [vmem:[#allocation11] sm:$0x1] %vm89_vm6, %v767_v15  ;;  %s475_s7 = sshll.u32 %s768_s2, 4  ;;  %s476_s7 = int_to_ptr.vmem [resolvable:$true] %s475_s7 }
  0x3a   :  { %551 = vmatpush3.msra.mxu0 %v92_v26  ;;  %577 = vmatpush3.msra.mxu1 %v92_v26  ;;  %91 = vst.msk [vmem:[#allocation12] sm:$0x1] %vm89_vm6, %v767_v15  ;;  %s665_s8 = scalar_lea.vmem %s476_s7, 16  ;;  %s669_s9 = scalar_lea.vmem %s476_s7, 32 }
  0x3b   :  { %vm131_vm0 = vcmp.lt.s32.totalorder %v130_v1, 4  ;;  %p666_p10 = scmp.ne.s32.totalorder %s476_s7, %s665_s8  ;;  %p670_p11 = scmp.lt.s32.totalorder %s476_s7, %s476_s7 }
  0x3c   :  { %v132_v3 = vsel %vm131_vm0, 0.0, %v766_v2  ;;  %p671_p12 = scmp.lt.s32.totalorder %s669_s9, %s665_s8 }
  0x3d   :  { %v133_v5 = vadd.f32 %v132_v3, %v845_v4 }
  0x3e   :  { %p672_p13 = por %p671_p12, %p670_p11 }
  0x3f   :  { %134 = vmax.xlane.f32.xlu0 %v133_v5 }
  0x40   :  { %v429_v31 = vld [vmem:[#allocation9] sm:$0x1]  ;;  %p673_p0 = pnand %p672_p13, %p666_p10 }
  0xcc   :  { %v135_v6 = vpop.xlane.xlu0 %134 }
  0xcd   :  { %vm136_vm1 = vcmp.eq.f32.partialorder %v133_v5, %v135_v6 }
  0xce   :  { %v137_v7 = vsel %vm136_vm1, %v130_v1, 128 }
  0xcf   :  { %v139_v8 = vshra.s32 %v137_v7, 16  ;;  %v138_v10 = vand.u32 65535, %v137_v7 }
  0xd1   :  { %v141_v9 = vcvt.s32.f32 %v139_v8  ;;  %v140_v12 = vcvt.s32.f32 %v138_v10 }
  0xd3   :  { %142 = vmin.xlane.f32.xlu0 %v141_v9 }
 0x160   :  { %v143_v11 = vpop.xlane.xlu0 %142 }
 0x161   :  { %vm144_vm2 = vcmp.eq.f32.partialorder %v141_v9, %v143_v11  ;;  %v149_v16 = vcvt.f32.s32 %v143_v11 }
 0x162   :  { %v145_v13 = vsel %vm144_vm2, %v140_v12, inf }
 0x163   :  { %146 = vmin.xlane.f32.xlu1 %v145_v13  ;;  %v150_v18 = vshll.u32 %v149_v16, 16 }
 0x167   :  { %95 = vmax.xlane.f32.xlu1 %v93_v14 }
 0x1f0   :  { %v147_v17 = vpop.xlane.xlu1 %146 }
 0x1f1   :  { %v148_v19 = vcvt.f32.s32 %v147_v17 }
 0x1f3   :  { %v151_v20 = vadd.s32 %v150_v18, %v148_v19 }
 0x1f4   :  { %v96_v21 = vpop.xlane.xlu1 %95 }
 0x1f5   :  { %v97_v22 = vsub.f32 %v93_v14, %v96_v21  ;;  %vm152_vm3 = vcmp.eq.s32.totalorder %v130_v1, %v151_v20 }
 0x1f6   :  { %v516_v23 = vsel %vm152_vm3, 1.0, %v767_v15 }
 0x1f7   :  { %v98_v24 = vmul.f32 1.442695, %v97_v22  ;;  %171 = vxpose.xlu0.b32.start.end [1/1] (short) %v516_v23, 128  ;;  %v430_v25 = vrot.slane %v516_v23, 4  ;;  %v118_v53 = vmul.f32 %v97_v22, %v845_v4 }
 0x1f9   :  { %595 = vpow2.f32 %v98_v24  ;;  %v431_v27 = vadd.f32 %v516_v23, %v430_v25 }
 0x1fb   :  { %v432_v28 = vrot.slane %v431_v27, 2 }
 0x1fd   :  { %v433_v29 = vadd.f32 %v432_v28, %v431_v27 }
 0x1ff   :  { %v434_v30 = vrot.slane %v433_v29, 1 }
 0x201   :  { %v435_v32 = vadd.f32 %v434_v30, %v433_v29 }
 0x203   :  { %v596_v33 = vpop.eup %595  ;;  %v436_v34 = vadd.f32 %v435_v32, %v429_v31 }
 0x204   :  { %100 = vadd.xlane.f32.xlu1 %v596_v33 }
 0x205   :  { %437 = vst [vmem:[#allocation9] sm:$0x1] %v436_v34 }
 0x208   :  { %104 = vadd.xlane.f32.xlu1 %v845_v4 }
 0x277   :  { %v187_v35 = vpop.trf.xlu0 }
 0x278   :  { %552 = vmatprep.mubr.msk.f32.mxu0 %vm203_vm4, %v187_v35 }
 0x27b   :  { %v188_v36 = vpop.trf.xlu0 }
 0x27c   :  { %553 = vmatmul.mubr.msk.f32.vlgmr.msra.gmra.mrb[0].mxu0 %vm203_vm4, %v188_v36 }
 0x27f   :  { %v189_v37 = vpop.trf.xlu0 }
 0x280   :  { %555 = vmatprep.mubr.msk.f32.mxu0 %vm203_vm4, %v189_v37 }
 0x283   :  { %v190_v38 = vpop.trf.xlu0 }
 0x284   :  { %556 = vmatmul.mubr.msk.f32.gmra.mrb[2].mxu0 %vm203_vm4, %v190_v38 }
 0x287   :  { %v191_v39 = vpop.trf.xlu0 }
 0x288   :  { %558 = vmatprep.mubr.msk.f32.mxu0 %vm203_vm4, %v191_v39 }
 0x28b   :  { %v192_v40 = vpop.trf.xlu0 }
 0x28c   :  { %559 = vmatmul.mubr.msk.f32.gmra.mrb[4].mxu0 %vm203_vm4, %v192_v40 }
 0x28f   :  { %v193_v41 = vpop.trf.xlu0 }
 0x290   :  { %561 = vmatprep.mubr.msk.f32.mxu0 %vm203_vm4, %v193_v41 }
 0x291   :  { %v101_v42 = vpop.xlane.xlu1 %100 }
 0x292   :  { %597 = vlog2.f32 %v101_v42 }
 0x293   :  { %v194_v43 = vpop.trf.xlu0 }
 0x294   :  { %562 = vmatmul.mubr.msk.f32.gmra.mrb[6].mxu0 %vm203_vm4, %v194_v43 }
 0x295   :  { %v105_v47 = vpop.xlane.xlu1 %104 }
 0x297   :  { %v195_v44 = vpop.trf.xlu0 }
 0x298   :  { %564 = vmatprep.mubr.msk.f32.mxu1 %vm203_vm4, %v195_v44 }
 0x29b   :  { %v196_v45 = vpop.trf.xlu0 }
 0x29c   :  { %v598_v46 = vpop.eup %597  ;;  %565 = vmatmul.mubr.msk.f32.vlgmr.msra.gmra.mrb[0].mxu1 %vm203_vm4, %v196_v45 }
 0x29d   :  { %v103_v48 = vmul.f32 0.6931472, %v598_v46 }
 0x29f   :  { %v106_v49 = vmul.f32 %v105_v47, %v103_v48  ;;  %v197_v50 = vpop.trf.xlu0 }
 0x2a0   :  { %567 = vmatprep.mubr.msk.f32.mxu1 %vm203_vm4, %v197_v50 }
 0x2a1   :  { %v108_v51 = vsel %vm107_vm5, %v106_v49, 0.0 }
 0x2a2   :  { %109 = vadd.xlane.f32.xlu1 %v108_v51 }
 0x2a3   :  { %v198_v52 = vpop.trf.xlu0 }
 0x2a4   :  { %568 = vmatmul.mubr.msk.f32.gmra.mrb[2].mxu1 %vm203_vm4, %v198_v52 }
 0x2a6   :  { %119 = vadd.xlane.f32.xlu1 %v118_v53 }
 0x2a7   :  { %v199_v55 = vpop.trf.xlu0 }
 0x2a8   :  { %570 = vmatprep.mubr.msk.f32.mxu1 %vm203_vm4, %v199_v55 }
 0x2aa   :  { %445 = vadd.xlane.f32.xlu1 %v444_v54 }
 0x2ab   :  { %v200_v56 = vpop.trf.xlu0 }
 0x2ac   :  { %571 = vmatmul.mubr.msk.f32.gmra.mrb[4].mxu1 %vm203_vm4, %v200_v56 }
 0x2af   :  { %v201_v57 = vpop.trf.xlu0 }
 0x2b0   :  { %573 = vmatprep.mubr.msk.f32.mxu1 %vm203_vm4, %v201_v57 }
 0x2b3   :  { %v202_v58 = vpop.trf.xlu0 }
 0x2b4   :  { %574 = vmatmul.mubr.msk.f32.gmra.mrb[6].mxu1 %vm203_vm4, %v202_v58 }
 0x2b5   :  { %676 = shalt.err (!%p673_p0)
}
 0x2b6   :  { %s677_s12 = scalar_lea.hbm %s934_s4, 16 }
 0x2b7   :  { %p678_p1 = scmp.ne.s32.totalorder %s934_s4, %s677_s12  ;;  %p681_p2 = scmp.lt.u32.totalorder %s677_s12, %s934_s4 }
 0x2b9   :  { %p683_p3 = pnand %p681_p2, %p678_p1 }
 0x2bb   :  { %686 = shalt.err (!%p683_p3)
}
 0x2bc   :  { %478 = dma.vmem_to_hbm [thread:$0]  %s476_s7, 16, %s934_s4, [#allocation10]   ;;  %v438_v26 = vld [vmem:[#allocation11] sm:$0x1]  ;;  %v443_v28 = vld [vmem:[#allocation12] sm:$0x1] }
 0x2bd   :  { %s769_s20 = smov [#allocation11]   ;;  %s770_s22 = smov [#allocation12]  }
 0x2be   :  { %s485_s21 = sshll.u32 %s769_s20, 4  ;;  %s495_s23 = sshll.u32 %s770_s22, 4  ;;  %s486_s21 = int_to_ptr.vmem [resolvable:$true] %s485_s21  ;;  %s885_s23 = int_to_ptr.vmem [resolvable:$true] %s495_s23 }
 0x2bf   :  { %s687_s26 = scalar_lea.vmem %s486_s21, 16  ;;  %s691_s27 = scalar_lea.vmem %s486_s21, 32 }
 0x2c0   :  { %p688_p4 = scmp.ne.s32.totalorder %s486_s21, %s687_s26  ;;  %p692_p5 = scmp.lt.s32.totalorder %s486_s21, %s486_s21 }
 0x2c1   :  { %p693_p6 = scmp.lt.s32.totalorder %s691_s27, %s687_s26 }
 0x2c3   :  { %p694_p7 = por %p693_p6, %p692_p5 }
 0x2c5   :  { %p695_p8 = pnand %p694_p7, %p688_p4 }
 0x32f   :  { %v110_v59 = vpop.xlane.xlu1 %109 }
 0x330   :  { %v111_v60 = vrot.slane %v110_v59, 4 }
 0x332   :  { %v112_v61 = vadd.f32 %v111_v60, %v110_v59 }
 0x333   :  { %v120_v62 = vpop.xlane.xlu1 %119 }
 0x334   :  { %v113_v63 = vrot.slane %v112_v61, 2  ;;  %v121_v0 = vrot.slane %v120_v62, 4 }
 0x336   :  { %v122_v1 = vadd.f32 %v121_v0, %v120_v62  ;;  %v114_v2 = vadd.f32 %v113_v63, %v112_v61 }
 0x337   :  { %v446_v3 = vpop.xlane.xlu1 %445 }
 0x338   :  { %v123_v4 = vrot.slane %v122_v1, 2  ;;  %v115_v5 = vrot.slane %v114_v2, 1  ;;  %v447_v6 = vrot.slane %v446_v3, 4 }
 0x33a   :  { %v116_v7 = vadd.f32 %v115_v5, %v114_v2  ;;  %v124_v8 = vadd.f32 %v123_v4, %v122_v1  ;;  %v448_v9 = vadd.f32 %v447_v6, %v446_v3 }
 0x33c   :  { %578 = vpush %v116_v7  ;;  %v125_v10 = vrot.slane %v124_v8, 1  ;;  %v449_v11 = vrot.slane %v448_v9, 2 }
 0x33e   :  { %v126_v12 = vadd.f32 %v125_v10, %v124_v8  ;;  %v450_v13 = vadd.f32 %v449_v11, %v448_v9 }
 0x340   :  { %580 = vpush %v126_v12  ;;  %v451_v14 = vrot.slane %v450_v13, 1 }
 0x342   :  { %v452_v15 = vadd.f32 %v451_v14, %v450_v13 }
 0x344   :  { %582 = vpush %v452_v15 }
 0x34f   :  { %v554_v16 = vpop.f32.mrb[0].mxu0 }
 0x350   :  { %v318_v17 = vpop.f32.mrb[1].mxu0  ;;  %414 = vst [vmem:[#allocation8 + $0x8] sm:$0xff] %v554_v16 }
 0x351   :  { %413 = vst [vmem:[#allocation8] sm:$0xff] %v318_v17 }
 0x357   :  { %v557_v18 = vpop.f32.mrb[2].mxu0 }
 0x358   :  { %v328_v19 = vpop.f32.mrb[3].mxu0  ;;  %416 = vst [vmem:[#allocation8 + $0x18] sm:$0xff] %v557_v18 }
 0x359   :  { %415 = vst [vmem:[#allocation8 + $0x10] sm:$0xff] %v328_v19 }
 0x35f   :  { %v560_v20 = vpop.f32.mrb[4].mxu0 }
 0x360   :  { %v338_v21 = vpop.f32.mrb[5].mxu0  ;;  %418 = vst [vmem:[#allocation8 + $0x28] sm:$0xff] %v560_v20 }
 0x361   :  { %417 = vst [vmem:[#allocation8 + $0x20] sm:$0xff] %v338_v21 }
 0x367   :  { %v563_v22 = vpop.f32.mrb[6].mxu0 }
 0x368   :  { %v348_v23 = vpop.f32.mrb[7].mxu0  ;;  %420 = vst [vmem:[#allocation8 + $0x38] sm:$0xff] %v563_v22 }
 0x369   :  { %419 = vst [vmem:[#allocation8 + $0x30] sm:$0xff] %v348_v23 }
 0x36d   :  { %s579_s4 = spop %578 }
 0x36f   :  { %v566_v24 = vpop.f32.mrb[0].mxu1 }
 0x370   :  { %v358_v25 = vpop.f32.mrb[1].mxu1  ;;  %422 = vst [vmem:[#allocation8 + $0x48] sm:$0xff] %v566_v24 }
 0x371   :  { %s581_s1 = spop %580  ;;  %421 = vst [vmem:[#allocation8 + $0x40] sm:$0xff] %v358_v25 }
 0x372   :  { %s128_s19 = ssub.f32 %s579_s4, %s581_s1 }
 0x374   :  { %v439_v27 = vstv %s128_s19 }
 0x375   :  { %v440_v29 = vadd.f32 %v439_v27, %v438_v26  ;;  %s583_s25 = spop %582 }
 0x376   :  { %v454_v30 = vstv %s583_s25 }
 0x377   :  { %442 = vst.msk [vmem:[#allocation11] sm:$0x1] %vm89_vm6, %v440_v29  ;;  %v569_v31 = vpop.f32.mrb[2].mxu1  ;;  %v455_v32 = vadd.f32 %v454_v30, %v443_v28 }
 0x378   :  { %v368_v33 = vpop.f32.mrb[3].mxu1 }
 0x379   :  { %698 = shalt.err (!%p695_p8)
}
 0x37a   :  { %s699_s30 = scalar_lea.hbm %s935_s5, 16 }
 0x37b   :  { %p700_p9 = scmp.ne.s32.totalorder %s935_s5, %s699_s30  ;;  %p703_p10 = scmp.lt.u32.totalorder %s699_s30, %s935_s5 }
 0x37d   :  { %p705_p11 = pnand %p703_p10, %p700_p9 }
 0x37f   :  { %708 = shalt.err (!%p705_p11)
}
 0x380   :  { %488 = dma.vmem_to_hbm [thread:$0]  %s486_s21, 16, %s935_s5, [#allocation10]   ;;  %456 = vst.msk [vmem:[#allocation12] sm:$0x1] %vm89_vm6, %v455_v32  ;;  %424 = vst [vmem:[#allocation8 + $0x58] sm:$0xff] %v569_v31 }
 0x381   :  { %s709_s10 = scalar_lea.vmem %s885_s23, 16  ;;  %s713_s11 = scalar_lea.vmem %s885_s23, 32 }
 0x382   :  { %p710_p12 = scmp.ne.s32.totalorder %s885_s23, %s709_s10  ;;  %p714_p13 = scmp.lt.s32.totalorder %s885_s23, %s885_s23 }
 0x383   :  { %p715_p0 = scmp.lt.s32.totalorder %s713_s11, %s709_s10 }
 0x385   :  { %p716_p1 = por %p715_p0, %p714_p13 }
 0x387   :  { %p717_p2 = pnand %p716_p1, %p710_p12 }
 0x389   :  { %720 = shalt.err (!%p717_p2)
}
 0x38a   :  { %s721_s14 = scalar_lea.hbm %s936_s6, 16 }
 0x38b   :  { %p722_p3 = scmp.ne.s32.totalorder %s936_s6, %s721_s14  ;;  %p725_p4 = scmp.lt.u32.totalorder %s721_s14, %s936_s6 }
 0x38d   :  { %p727_p5 = pnand %p725_p4, %p722_p3 }
 0x38f   :  { %730 = shalt.err (!%p727_p5)
}
 0x390   :  { %498 = dma.vmem_to_hbm [thread:$0]  %s885_s23, 16, %s936_s6, [#allocation13]   ;;  %423 = vst [vmem:[#allocation8 + $0x50] sm:$0xff] %v368_v33  ;;  %v572_v34 = vpop.f32.mrb[4].mxu1 }
 0x391   :  { %v378_v35 = vpop.f32.mrb[5].mxu1  ;;  %426 = vst [vmem:[#allocation8 + $0x68] sm:$0xff] %v572_v34  ;;  %s771_s1 = smov [#allocation8]  }
 0x392   :  { %425 = vst [vmem:[#allocation8 + $0x60] sm:$0xff] %v378_v35  ;;  %s462_s19 = sshll.u32 %s771_s1, 4  ;;  %v575_v36 = vpop.f32.mrb[6].mxu1  ;;  %s463_s19 = int_to_ptr.vmem [resolvable:$true] %s462_s19 }
 0x393   :  { %v388_v37 = vpop.f32.mrb[7].mxu1  ;;  %428 = vst [vmem:[#allocation8 + $0x78] sm:$0xff] %v575_v36  ;;  %s731_s20 = scalar_lea.vmem %s463_s19, 2048  ;;  %p736_p7 = scmp.lt.s32.totalorder %s463_s19, %s463_s19 }
 0x394   :  { %427 = vst [vmem:[#allocation8 + $0x70] sm:$0xff] %v388_v37  ;;  %p732_p6 = scmp.ne.s32.totalorder %s463_s19, %s731_s20  ;;  %p737_p8 = scmp.lt.s32.totalorder %s731_s20, %s731_s20 }
 0x396   :  { %p738_p9 = por %p737_p8, %p736_p7 }
 0x398   :  { %p739_p10 = pnand %p738_p9, %p732_p6 }
 0x39a   :  { %742 = shalt.err (!%p739_p10)
}
 0x39b   :  { %s743_s22 = scalar_lea.hbm %s933_s3, 2048 }
 0x39c   :  { %p744_p11 = scmp.ne.s32.totalorder %s933_s3, %s743_s22  ;;  %p747_p12 = scmp.lt.u32.totalorder %s743_s22, %s933_s3 }
 0x39e   :  { %p749_p13 = pnand %p747_p12, %p744_p11 }
 0x3a0   :  { %752 = shalt.err (!%p749_p13)
}
 0x3a1   :  { %s772_s28 = smov 128   ;;  %s773_s29 = smov 8  }
 0x3a2   :  { %468 = dma.vmem_to_hbm [thread:$0]  %s463_s19, 2048, %s933_s3, [#allocation4], %s772_s28, %s772_s28, %s773_s29  }
 0x3a3   :  { %757 = dma.done.wait [#allocation4], 2048  }
 0x3a4   :  { %758 = vsyncadd [#allocation4], 4294965248 }
 0x3a5   :  { %759 = dma.done.wait [#allocation10], 32  }
 0x3a6   :  { %760 = vsyncadd [#allocation10], 4294967264 }
 0x3a7   :  { %761 = dma.done.wait [#allocation13], 16  }
 0x3a8   :  { %762 = vsyncadd [#allocation13], 4294967280 }
 0x3a9   :  { %511 = vsyncpa [#allocation3], 1 }
 0x3aa   :  { %512 = vsyncpa [#allocation6], 1 }
 0x3ab   :  { %513 = vsyncpa [#allocation4], 1 }
 0x3ac   :  { %514 = vsyncpa [#allocation10], 1 }
 0x3ad   :  { %515 = vsyncpa [#allocation13], 1 }

</bundles_post_ra>
